<compile_context>
chip_gen: v7x
topology: tpu7x:2x2x1
jax: 0.10.0
libtpu: 0.0.40
codegen_flags: <defaults>
</compile_context>

<pallas_src>
import jax
import jax.numpy as jnp
from jax.experimental import pallas as pl
from jax.experimental.pallas import tpu as pltpu


def _round_up(n, m):
    return ((n + m - 1) // m) * m


def mlp_kernel(x_ref, w1_ref, b1_ref, w2_ref, b2_ref, out_ref):
    # hidden = relu(x @ W1 + b1); matmul operands in bf16, accumulate in f32.
    x = x_ref[...].astype(jnp.bfloat16)
    h = jnp.dot(x, w1_ref[...], preferred_element_type=jnp.float32) + b1_ref[...]
    h = jnp.maximum(h, 0.0).astype(jnp.bfloat16)

    # logits = h @ W2 + b2. Padded W2 rows/columns are zero and padded b2
    # lanes are -1e30, so padded class lanes contribute exp(...) == 0 below.
    logits = jnp.dot(h, w2_ref[...], preferred_element_type=jnp.float32) + b2_ref[...]

    # Numerically-stable softmax over the (lane-dense) class dim, in f32.
    m = jnp.max(logits, axis=-1, keepdims=True)
    e = jnp.exp(logits - m)
    denom = jnp.sum(e, axis=-1, keepdims=True)

    # EUP approximate reciprocal + one Newton refinement -> f32-accurate,
    # keeps the divide off the VALU critical path.
    r = pl.reciprocal(denom, approx=True)
    r = r * (2.0 - denom * r)

    out_ref[...] = (e * r).astype(out_ref.dtype)


def _choose_tb(batch, tb_req):
    b8 = _round_up(batch, 8)
    tb = max(8, _round_up(min(tb_req, b8), 8))
    # Keep at least two batch tiles when the batch allows it so megacore
    # (v7x) has work for both TensorCores; harmless on single-TC chips.
    if tb >= b8 and b8 >= 16:
        tb = _round_up(b8 // 2, 8)
    # Large tiles: align to 256 to fill the 2x256 MXU on v6e/v7x.
    if tb >= 512:
        tb = (tb // 256) * 256
    return tb


def double_perceptron_forward(x, w1, b1, w2, b2, *, tb=512):
    """x: (B, V); w1: (V, H); b1: (1, H); w2: (H, C); b2: (1, C) -> (B, C) probs."""
    B, V = x.shape
    H = w1.shape[1]
    C = w2.shape[1]

    # Lane/sublane friendly padding (zero pad is semantics preserving: padded
    # hidden units see zero weights/bias; padded class lanes get -1e30 bias so
    # they vanish from the softmax; padded batch rows are sliced away).
    V_p = _round_up(V, 128)
    H_p = _round_up(H, 128)
    C_p = _round_up(C, 128)
    tb = _choose_tb(B, tb)
    B_p = _round_up(B, tb)

    # Only touch x if padding is actually required (avoids a full extra HBM
    # read+write of the dominant activation stream in the aligned case).
    if B_p != B or V_p != V:
        x_p = jnp.pad(x, ((0, B_p - B), (0, V_p - V)))
    else:
        x_p = x

    # Weights: pad once and cast to bf16 for the fast MXU path (small, reused
    # for every batch tile). Biases stay f32; b2's padded lanes get -1e30.
    w1_p = jnp.pad(w1, ((0, V_p - V), (0, H_p - H))).astype(jnp.bfloat16)
    b1_p = jnp.pad(b1, ((0, 0), (0, H_p - H))).astype(jnp.float32)
    w2_p = jnp.pad(w2, ((0, H_p - H), (0, C_p - C))).astype(jnp.bfloat16)
    b2_p = jnp.pad(b2, ((0, 0), (0, C_p - C)),
                   constant_values=-1e30).astype(jnp.float32)

    grid = (B_p // tb,)

    x_bytes = x_p.dtype.itemsize
    flops = 2 * B_p * (V_p * H_p + H_p * C_p)
    bytes_accessed = (
        B_p * V_p * x_bytes                       # activations in
        + 2 * (V_p * H_p + H_p * C_p)             # bf16 weights
        + 4 * (H_p + C_p)                         # biases
        + 4 * B_p * C_p                           # probs out
    )

    # Scoped VMEM budget from the actual footprint (double-buffered x/out
    # tiles + resident bf16 weights + intermediates), clamped to a range that
    # is valid on v5e (16 MiB default), v6e (128 MiB phys) and v7x (64 MiB).
    vmem_need = (
        2 * 2 * (V_p * H_p + H_p * C_p)           # weights (worst-case 2 bufs)
        + 2 * 4 * (H_p + C_p)                     # biases
        + 2 * tb * V_p * x_bytes                  # x tiles, double buffered
        + 2 * tb * C_p * 4                        # out tiles, double buffered
        + 4 * tb * (H_p + 4 * C_p)                # in-kernel intermediates
    )
    vmem_limit = int(min(max(2 * vmem_need, 32 << 20), 64 << 20))

    out_p = pl.pallas_call(
        mlp_kernel,
        out_shape=jax.ShapeDtypeStruct((B_p, C_p), jnp.float32),
        grid=grid,
        in_specs=[
            pl.BlockSpec((tb, V_p), lambda i: (i, 0)),    # batch-tiled activations
            pl.BlockSpec((V_p, H_p), lambda i: (0, 0)),   # W1 resident across tiles
            pl.BlockSpec((1, H_p), lambda i: (0, 0)),     # b1 resident
            pl.BlockSpec((H_p, C_p), lambda i: (0, 0)),   # W2 resident
            pl.BlockSpec((1, C_p), lambda i: (0, 0)),     # b2 resident (-1e30 pad lanes)
        ],
        out_specs=pl.BlockSpec((tb, C_p), lambda i: (i, 0)),  # lane-dense stores
        compiler_params=pltpu.CompilerParams(
            dimension_semantics=("parallel",),   # shard batch tiles across TCs (v7x)
            vmem_limit_bytes=vmem_limit,
        ),
        cost_estimate=pl.CostEstimate(
            flops=flops,
            transcendentals=B_p * C_p,
            bytes_accessed=bytes_accessed,
        ),
    )(x_p, w1_p, b1_p, w2_p, b2_p)

    return out_p[:B, :C]


def xavier_normal(key, fan_in, fan_out):
    # torch.nn.init.xavier_normal_: std = sqrt(2 / (fan_in + fan_out))
    std = (2.0 / (fan_in + fan_out)) ** 0.5
    return std * jax.random.normal(key, (fan_in, fan_out), dtype=jnp.float32)


if __name__ == "__main__":
    # Shapes consistent with the module's forward:
    #   vocabulary_len=128, hidden_dimension=32, nb_classes=8, batch=64
    # The tb clamp yields tb=32 -> grid=(2,), exercising the multi-tile path
    # with no activation padding at all (B % tb == 0, V % 128 == 0).
    batch, vocab, hidden, nb_classes = 64, 128, 32, 8

    key = jax.random.PRNGKey(0)
    kx, kw1, kb1, kw2, kb2 = jax.random.split(key, 5)

    x = jax.random.normal(kx, (batch, vocab), dtype=jnp.float32)

    # input_layer: Linear(vocab -> hidden), weight xavier_normal (stored
    # pre-transposed as (in, out)), bias PyTorch-default U(-1/sqrt(fan_in), .).
    w1 = xavier_normal(kw1, vocab, hidden)                       # (V, H)
    b1 = jax.random.uniform(kb1, (1, hidden), jnp.float32,
                            -1.0 / vocab ** 0.5, 1.0 / vocab ** 0.5)
    # output_layer: Linear(hidden -> nb_classes)
    w2 = xavier_normal(kw2, hidden, nb_classes)                  # (H, C)
    b2 = jax.random.uniform(kb2, (1, nb_classes), jnp.float32,
                            -1.0 / hidden ** 0.5, 1.0 / hidden ** 0.5)

    out = double_perceptron_forward(x, w1, b1, w2, b2)
    out = jax.block_until_ready(out)

    # Sanity checks against a plain-JAX f32 reference (same params, same math).
    # Tolerance is loosened because the kernel's matmul operands are bf16.
    h_ref = jnp.maximum(x @ w1 + b1, 0.0)
    ref = jax.nn.softmax(h_ref @ w2 + b2, axis=-1)
    assert out.shape == (batch, nb_classes)
    assert jnp.allclose(out, ref, atol=2e-2, rtol=0.0)
    assert jnp.allclose(out.sum(axis=-1), 1.0, atol=1e-3)

    print("KERNEL_OK")
</pallas_src>

<mosaic_0001>
module attributes {stable_mosaic.version = 11 : i64} {
  func.func @mlp_kernel(%arg0: i32, %arg1: memref<32x128xf32, #tpu.memory_space<vmem>>, %arg2: memref<128x128xbf16, #tpu.memory_space<vmem>>, %arg3: memref<1x128xf32, #tpu.memory_space<vmem>>, %arg4: memref<128x128xbf16, #tpu.memory_space<vmem>>, %arg5: memref<1x128xf32, #tpu.memory_space<vmem>>, %arg6: memref<32x128xf32, #tpu.memory_space<vmem>>) attributes {dimension_semantics = [#tpu.dimension_semantics<parallel>], iteration_bounds = array<i64: 2>, scalar_prefetch = 0 : i64, scratch_operands = 0 : i64, tpu.core_type = #tpu.core_type<tc>, window_params = [{transform_indices = @transform_0, window_bounds = array<i64: 32, 128>}, {pipeline_mode = #tpu.pipeline_mode<synchronous>, transform_indices = @transform_1, window_bounds = array<i64: 128, 128>}, {pipeline_mode = #tpu.pipeline_mode<synchronous>, transform_indices = @transform_2, window_bounds = array<i64: 1, 128>}, {pipeline_mode = #tpu.pipeline_mode<synchronous>, transform_indices = @transform_3, window_bounds = array<i64: 128, 128>}, {pipeline_mode = #tpu.pipeline_mode<synchronous>, transform_indices = @transform_4, window_bounds = array<i64: 1, 128>}, {transform_indices = @transform_5, window_bounds = array<i64: 32, 128>}]} {
    %c0 = arith.constant 0 : index
    %c0_0 = arith.constant 0 : index
    %0 = vector.load %arg1[%c0, %c0_0] : memref<32x128xf32, #tpu.memory_space<vmem>>, vector<32x128xf32>
    %1 = arith.truncf %0 : vector<32x128xf32> to vector<32x128xbf16>
    %c0_1 = arith.constant 0 : index
    %c0_2 = arith.constant 0 : index
    %2 = vector.load %arg2[%c0_1, %c0_2] : memref<128x128xbf16, #tpu.memory_space<vmem>>, vector<128x128xbf16>
    %cst = arith.constant dense<0.000000e+00> : vector<32x128xf32>
    %3 = tpu.matmul %1, %2, %cst {dimension_numbers = #tpu.dot_dimension_numbers<[1], [0], [0], [1], [0, 0, 1, 1], [], []>} : vector<32x128xbf16>, vector<128x128xbf16>, vector<32x128xf32> -> vector<32x128xf32>
    %c0_3 = arith.constant 0 : index
    %c0_4 = arith.constant 0 : index
    %4 = vector.load %arg3[%c0_3, %c0_4] : memref<1x128xf32, #tpu.memory_space<vmem>>, vector<1x128xf32>
    %5 = vector.broadcast %4 : vector<1x128xf32> to vector<32x128xf32>
    %6 = arith.addf %3, %5 : vector<32x128xf32>
    %cst_5 = arith.constant 0.000000e+00 : f32
    %7 = vector.broadcast %cst_5 : f32 to vector<32x128xf32>
    %8 = arith.maximumf %6, %7 : vector<32x128xf32>
    %9 = arith.truncf %8 : vector<32x128xf32> to vector<32x128xbf16>
    %c0_6 = arith.constant 0 : index
    %c0_7 = arith.constant 0 : index
    %10 = vector.load %arg4[%c0_6, %c0_7] : memref<128x128xbf16, #tpu.memory_space<vmem>>, vector<128x128xbf16>
    %cst_8 = arith.constant dense<0.000000e+00> : vector<32x128xf32>
    %11 = tpu.matmul %9, %10, %cst_8 {dimension_numbers = #tpu.dot_dimension_numbers<[1], [0], [0], [1], [0, 0, 1, 1], [], []>} : vector<32x128xbf16>, vector<128x128xbf16>, vector<32x128xf32> -> vector<32x128xf32>
    %c0_9 = arith.constant 0 : index
    %c0_10 = arith.constant 0 : index
    %12 = vector.load %arg5[%c0_9, %c0_10] : memref<1x128xf32, #tpu.memory_space<vmem>>, vector<1x128xf32>
    %13 = vector.broadcast %12 : vector<1x128xf32> to vector<32x128xf32>
    %14 = arith.addf %11, %13 : vector<32x128xf32>
    %cst_11 = arith.constant dense<0xFF800000> : vector<32xf32>
    %15 = vector.multi_reduction <maximumf>, %14, %cst_11 [1] : vector<32x128xf32> to vector<32xf32>
    %16 = vector.shape_cast %15 : vector<32xf32> to vector<32x1xf32>
    %17 = vector.broadcast %16 : vector<32x1xf32> to vector<32x128xf32>
    %18 = arith.subf %14, %17 : vector<32x128xf32>
    %19 = math.exp %18 : vector<32x128xf32>
    %cst_12 = arith.constant dense<0.000000e+00> : vector<32xf32>
    %20 = vector.multi_reduction <add>, %19, %cst_12 [1] : vector<32x128xf32> to vector<32xf32>
    %21 = vector.shape_cast %20 : vector<32xf32> to vector<32x1xf32>
    %22 = tpu.reciprocal %21 {approx = true} : vector<32x1xf32> -> vector<32x1xf32>
    %23 = arith.mulf %21, %22 : vector<32x1xf32>
    %cst_13 = arith.constant 2.000000e+00 : f32
    %24 = vector.broadcast %cst_13 : f32 to vector<32x1xf32>
    %25 = arith.subf %24, %23 : vector<32x1xf32>
    %26 = arith.mulf %22, %25 : vector<32x1xf32>
    %27 = vector.broadcast %26 : vector<32x1xf32> to vector<32x128xf32>
    %28 = arith.mulf %19, %27 : vector<32x128xf32>
    %c0_14 = arith.constant 0 : index
    %c0_15 = arith.constant 0 : index
    %29 = vector.load %arg6[%c0_14, %c0_15] : memref<32x128xf32, #tpu.memory_space<vmem>>, vector<32x128xf32>
    tpu.vector_store %arg6[%c0_14, %c0_15], %28 {strides = array<i32>} : memref<32x128xf32, #tpu.memory_space<vmem>>, vector<32x128xf32>,
    return
  }
  func.func @transform_0(%arg0: i32) -> (i32, i32) {
    %c0_i32 = arith.constant 0 : i32
    %c0_i32_0 = arith.constant 0 : i32
    return %arg0, %c0_i32 : i32, i32
  }
  func.func @transform_1(%arg0: i32) -> (i32, i32) {
    %c0_i32 = arith.constant 0 : i32
    %c0_i32_0 = arith.constant 0 : i32
    %c0_i32_1 = arith.constant 0 : i32
    return %c0_i32, %c0_i32_0 : i32, i32
  }
  func.func @transform_2(%arg0: i32) -> (i32, i32) {
    %c0_i32 = arith.constant 0 : i32
    %c0_i32_0 = arith.constant 0 : i32
    %c0_i32_1 = arith.constant 0 : i32
    return %c0_i32, %c0_i32_0 : i32, i32
  }
  func.func @transform_3(%arg0: i32) -> (i32, i32) {
    %c0_i32 = arith.constant 0 : i32
    %c0_i32_0 = arith.constant 0 : i32
    %c0_i32_1 = arith.constant 0 : i32
    return %c0_i32, %c0_i32_0 : i32, i32
  }
  func.func @transform_4(%arg0: i32) -> (i32, i32) {
    %c0_i32 = arith.constant 0 : i32
    %c0_i32_0 = arith.constant 0 : i32
    %c0_i32_1 = arith.constant 0 : i32
    return %c0_i32, %c0_i32_0 : i32, i32
  }
  func.func @transform_5(%arg0: i32) -> (i32, i32) {
    %c0_i32 = arith.constant 0 : i32
    %c0_i32_0 = arith.constant 0 : i32
    return %arg0, %c0_i32 : i32, i32
  }
}

</mosaic_0001>

<bundles_post_ra>
// kernel: tpu_custom_call.1
= control target key start
LH: loop header
LB: loop body
LE: loop exit
PB: predicated region body
PF: predicated region fallthrough
CT: control target
= control target key end

     0   :  { %10 = vsyncpa [#allocation3], 0  ;;  %s1336_s0 = inlined_call_operand.hbm [shape: f32[64,128], index: 0, kind: input, shape index: {}]   ;;  %s1337_s1 = inlined_call_operand.hbm [shape: bf16[128,128], index: 1, kind: input, shape index: {}]   ;;  %s1338_s2 = inlined_call_operand.vmem [shape: f32[1,128], index: 2, kind: input, shape index: {}]   ;;  %s1339_s3 = inlined_call_operand.hbm [shape: bf16[128,128], index: 3, kind: input, shape index: {}]   ;;  %s1340_s4 = inlined_call_operand.vmem [shape: f32[1,128], index: 4, kind: input, shape index: {}]   ;;  %s1341_s5 = inlined_call_operand.hbm [shape: f32[64,128], index: 5, kind: output, shape index: {}]  }
   0x1   :  { %12 = vsyncpa [#allocation3 + $0x1], 0 }
   0x2   :  { %13 = vsyncpa [#allocation6], 0 }
   0x3   :  { %14 = vsyncpa [#allocation4], 0 }
   0x4   :  { %16 = vsyncpa [#allocation4 + $0x1], 0  ;;  %s1086_s18 = smov 0   ;;  %s1088_s19 = smov 0  }
   0x5   :  { %s1090_s20 = smov 0   ;;  %s1092_s21 = smov 0  }
   0x6 LB: > { %s1107_s22 = sadd.s32 4294967295, %s1044_s21   ;;  %s685_s23 = sadd.s32 4294967294, %s1044_s21   ;;  %s1044_s21 = sphi %s1092_s21, %s1361_s21   ;;  %s1040_s20 = sphi %s1090_s20, %s1360_s20   ;;  %s1036_s19 = sphi %s1088_s19, %s1359_s19   ;;  %s1032_s18 = sphi %s1086_s18, %s1358_s18  }
   0x7   : > { %p42_p0 = scmp.ne.s32.totalorder %s1036_s19, %s1032_s18  ;;  %p1342_p1 = scmp.eq.s32.totalorder %s1107_s22, 0 }
   0x8   : > { %p156_p3 = scmp.eq.s32.totalorder %s685_s23, 1  ;;  %p686_p5 = scmp.ge.s32.totalorder %s1044_s21, 1 }
   0x9   : > { %p1116_p4 = por %p1342_p1, %p42_p0  ;;  %p163_p7 = scmp.lt.s32.totalorder %s1044_s21, 3 }
   0xa   : > { %p1121_p6 = por %p156_p3, %p42_p0  ;;  %s1046_s27 = smov [#allocation5]  }
   0xb   : > { %s1345_s24 = scalar_select %p1116_p4, 1, 0 }
   0xc   : > { %s1346_s25 = scalar_select %p1121_p6, 1, 0 }
   0xd   : > { %p1126_p8 = pnand %p686_p5, %p163_p7  ;;  %s175_s28 = sshll.u32 %s1046_s27, 4  ;;  %s1130_s28 = int_to_ptr.vmem [resolvable:$true] %s175_s28 }
   0xe   : > { %s1047_s30 = smov [#allocation7]   ;;  %s888_s9 = scalar_lea.hbm %s1337_s1, 1024 }
   0xf   : > { %p795_p9 = pneg %p1126_p8  ;;  %s191_s6 = sshll.u32 %s1047_s30, 4  ;;  %s1141_s6 = int_to_ptr.vmem [resolvable:$true] %s191_s6 }
  0x10   : > { %p889_p12 = scmp.ne.s32.totalorder %s1337_s1, %s888_s9  ;;  %p895_p5 = scmp.lt.u32.totalorder %s888_s9, %s1337_s1 }
  0x11   : > { %p1137_p11 = pnand %p795_p9, %p1342_p1 }
  0x13   : > { %p890_p13 = pneg %p1137_p11 }
  0x15   : > { %p891_p0 = pnand %p890_p13, %p889_p12 }
  0x17   : > { %p892_p3 = pneg %p891_p0 }
  0x19   : > { %p897_p7 = pnand %p895_p5, %p892_p3 }
  0x1b   : > { %900 = shalt.err (!%p897_p7)
}
  0x1c   : > { %s901_s14 = scalar_lea.vmem %s1130_s28, 1024  ;;  %p909_p2 = scmp.lt.s32.totalorder %s1130_s28, %s1130_s28 }
  0x1d   : > { %p902_p9 = scmp.ne.s32.totalorder %s1130_s28, %s901_s14  ;;  %p910_p12 = scmp.lt.s32.totalorder %s901_s14, %s901_s14 }
  0x1f   : > { %p904_p10 = pnand %p902_p9, %p890_p13  ;;  %p911_p0 = por %p910_p12, %p909_p2 }
  0x21   : > { %p905_p1 = pneg %p904_p10 }
  0x23   : > { %p912_p6 = pnand %p911_p0, %p905_p1 }
  0x25   : > { %915 = shalt.err (!%p912_p6)
}
  0x26   : > { %s1048_s15 = smov 64   ;;  %s1049_s16 = smov 4  }
  0x27   : > { %798 = dma.hbm_to_vmem [thread:$0]  (!%p1137_p11), %s1337_s1, 1024, %s1130_s28, [#allocation6], %s1048_s15, %s1048_s15, %s1049_s16  }
  0x28   : > { %s916_s7 = scalar_lea.hbm %s1339_s3, 1024 }
  0x29   : > { %p917_p2 = scmp.ne.s32.totalorder %s1339_s3, %s916_s7  ;;  %p923_p10 = scmp.lt.u32.totalorder %s916_s7, %s1339_s3 }
  0x2b   : > { %p919_p1 = pnand %p917_p2, %p890_p13 }
  0x2d   : > { %p920_p6 = pneg %p919_p1 }
  0x2f   : > { %p925_p3 = pnand %p923_p10, %p920_p6 }
  0x31   : > { %928 = shalt.err (!%p925_p3)
}
  0x32   : > { %s929_s28 = scalar_lea.vmem %s1141_s6, 1024  ;;  %p937_p12 = scmp.lt.s32.totalorder %s1141_s6, %s1141_s6 }
  0x33   : > { %p930_p5 = scmp.ne.s32.totalorder %s1141_s6, %s929_s28  ;;  %p938_p0 = scmp.lt.s32.totalorder %s929_s28, %s929_s28 }
  0x35   : > { %p932_p7 = pnand %p930_p5, %p890_p13  ;;  %p939_p2 = por %p938_p0, %p937_p12 }
  0x37   : > { %p933_p9 = pneg %p932_p7 }
  0x39   : > { %p940_p1 = pnand %p939_p2, %p933_p9 }
  0x3b   : > { %943 = shalt.err (!%p940_p1)
}
  0x3c   : > { %801 = dma.hbm_to_vmem [thread:$0]  (!%p1137_p11), %s1339_s3, 1024, %s1141_s6, [#allocation6], %s1048_s15, %s1048_s15, %s1049_s16  }
  0x3d   : > { %s1196_s14 = sadd.s32 1, %s1044_s21   ;;  %s29_s29 = sadd.s32 1, %s1040_s20 }
  0x3e   : > { %s26_s17 = ssub.s32 %s1044_s21, %s1196_s14  ;;  %p36_p13 = scmp.ne.s32.totalorder %s1040_s20, %s1036_s19 }
  0x3f   : > { %p27_p6 = scmp.eq.s32.totalorder %s26_s17, 0  ;;  %p37_p10 = scmp.eq.s32.totalorder %s1044_s21, 0 }
  0x40   : > { %p1349_p3 = scmp.eq.s32.totalorder %s1107_s22, 1  ;;  %p812_p7 = scmp.lt.s32.totalorder %s1044_s21, 2 }
  0x41   : > { %s1212_s27 = scalar_select %p27_p6, %s1040_s20, %s29_s29  }
  0x42   : > { %p1206_p5 = por %p1349_p3, %p36_p13  ;;  %p38_p9 = por %p37_p10, %p36_p13 }
  0x43   : > { %s208_s30 = sand.u32 1, %s1040_s20   ;;  %s721_s6 = sshll.u32 %s1044_s21, 9 }
  0x44   : > { %s1350_s23 = scalar_select %p1206_p5, 1, 0 }
  0x45   : > { %s690_s7 = sshll.u32 %s208_s30, 5  ;;  %s1219_s8 = scalar_lea.hbm %s1336_s0, %s721_s6 }
  0x46   : > { %s212_s9 = scalar_lea.vmem [#allocation2], %s690_s7  ;;  %p1223_p11 = pnand %p812_p7, %p38_p9 }
  0x47   : > { %s219_s10 = sshll.u32 %s212_s9, 4  ;;  %s1227_s28 = scalar_lea.sflag [#allocation3], %s208_s30  ;;  %s1221_s10 = int_to_ptr.vmem [resolvable:$true] %s219_s10 }
  0x48   : > { %s944_s12 = scalar_lea.hbm %s1219_s8, 512  ;;  %p946_p0 = pneg %p1223_p11 }
  0x49   : > { %p945_p12 = scmp.ne.s32.totalorder %s1219_s8, %s944_s12  ;;  %s949_s17 = scalar_lea.hbm %s1336_s0, 1024 }
  0x4a   : > { %p950_p13 = scmp.lt.u32.totalorder %s1219_s8, %s1336_s0  ;;  %p951_p6 = scmp.lt.u32.totalorder %s949_s17, %s944_s12 }
  0x4b   : > { %p947_p2 = pnand %p946_p0, %p945_p12  ;;  %p953_p3 = scmp.lt.u32.totalorder %s944_s12, %s1219_s8 }
  0x4c   : > { %p952_p10 = por %p951_p6, %p950_p13 }
  0x4d   : > { %p948_p1 = pneg %p947_p2 }
  0x4e   : > { %p954_p7 = por %p953_p3, %p952_p10 }
  0x50   : > { %p955_p9 = pnand %p954_p7, %p948_p1 }
  0x52   : > { %958 = shalt.err (!%p955_p9)
}
  0x53   : > { %s959_s30 = scalar_lea.vmem %s1221_s10, 512  ;;  %s1050_s15 = smov [#allocation2]  }
  0x54   : > { %p960_p12 = scmp.ne.s32.totalorder %s1221_s10, %s959_s30  ;;  %s964_s16 = sshll.u32 %s1050_s15, 4  ;;  %s965_s16 = int_to_ptr.vmem [resolvable:$false] %s964_s16 }
  0x55   : > { %s966_s9 = scalar_lea.vmem %s965_s16, 1024  ;;  %p967_p4 = scmp.lt.s32.totalorder %s1221_s10, %s965_s16 }
  0x56   : > { %p962_p2 = pnand %p960_p12, %p946_p0  ;;  %p968_p13 = scmp.lt.s32.totalorder %s966_s9, %s959_s30 }
  0x58   : > { %p963_p5 = pneg %p962_p2  ;;  %p969_p6 = por %p968_p13, %p967_p4 }
  0x5a   : > { %p970_p10 = pnand %p969_p6, %p963_p5 }
  0x5c   : > { %973 = shalt.err (!%p970_p10)
}
  0x5d   : > { %s1051_s12 = smov 128   ;;  %s1052_s13 = smov 8  }
  0x5e   : > { %805 = dma.hbm_to_vmem [thread:$0]  (!%p1223_p11), %s1219_s8, 512, %s1221_s10, %s1227_s28, %s1051_s12, %s1051_s12, %s1052_s13  }
  0x5f   : > { %231 = sbr.rel (%p1126_p8) target bundleno = 917 (0x395), region = 40  ;;  %s1258_s29 = sand.u32 (!%p1126_p8), 1, %s1036_s19  }
  0x60   : > { %s694_s17 = sshll.u32 (!%p1126_p8), %s1258_s29, 5  ;;  %s234_s7 = scalar_lea.sflag (!%p1126_p8), [#allocation3], %s1258_s29 }
  0x61   : > { %s1264_s6 = scalar_lea.vmem (!%p1126_p8), [#allocation2], %s694_s17  ;;  %p1352_p4 = scmp.ne.s32.totalorder (!%p1126_p8), %s1345_s24, 0 }
  0x66   : > { %1019 = dma.done.wait (%p1352_p4), %s234_s7, 512  }
  0x67   : > { %1021 = vsyncadd (%p1352_p4), %s234_s7, 4294966784  ;;  %p1353_p5 = scmp.eq.s32.totalorder %s1107_s22, 0 }
  0x69   : > { %1023 = dma.done.wait (%p1353_p5), [#allocation6], 2048   ;;  %p1354_p8 = pmov %p1353_p5 }
  0x6a   : > { %v856_v0 = vld [vmem:[#allocation5] sm:$0xff]   ;;  %v857_v1 = vld [vmem:[#allocation5 + $0x8] sm:$0xff]   ;;  %v858_v2 = vld [vmem:[#allocation5 + $0x10] sm:$0xff]   ;;  %s271_s11 = scalar_lea.vmem [#allocation8], %s694_s17  ;;  %s722_s30 = sshll.u32 %s1107_s22, 9 }
  0x6b   : > { %1025 = vsyncadd (%p1354_p8), [#allocation6], 4294965248  ;;  %743 = vmatprep.subr.bf16.mxu0 %v856_v0  ;;  %v859_v3 = vld [vmem:[#allocation5 + $0x18] sm:$0xff]   ;;  %v275_v4 = vld [vmem:[%s1264_s6] sm:$0xff]  ;;  %s593_s28 = sshll.u32 %s271_s11, 4  ;;  %s1292_s9 = scalar_lea.hbm %s1341_s5, %s722_s30  ;;  %s1287_s28 = int_to_ptr.vmem [resolvable:$true] %s593_s28 }
  0x6c   : > { %744 = vmatpush3.bf16.msra.mxu0 %v856_v0  ;;  %v276_v5 = vld [vmem:[%s1264_s6 + $0x8] sm:$0xff]  ;;  %v864_v7 = vld [vmem:[#allocation7] sm:$0xff]   ;;  %v866_v10 = vld [vmem:[#allocation7 + $0x10] sm:$0xff]   ;;  %s580_s12 = scalar_lea.sflag [#allocation4], %s1258_s29  ;;  %s974_s13 = scalar_lea.vmem %s1287_s28, 512 }
  0x6d   : > { %745 = vmatprep.subr.bf16.mxu0 %v857_v1  ;;  %v279_v6 = vpack.c.bf16 %v276_v5, %v275_v4  ;;  %v865_v8 = vld [vmem:[#allocation7 + $0x8] sm:$0xff]   ;;  %v860_v9 = vld [vmem:[#allocation5 + $0x20] sm:$0xff]   ;;  %763 = vmatprep.subr.bf16.mxu1 %v864_v7  ;;  %v867_v12 = vld [vmem:[#allocation7 + $0x18] sm:$0xff]   ;;  %p975_p11 = scmp.ne.s32.totalorder %s1287_s28, %s974_s13  ;;  %p1355_p0 = scmp.ne.s32.totalorder %s1350_s23, 0 }
  0x6e   : > { %764 = vmatpush3.bf16.msra.mxu1 %v864_v7  ;;  %v861_v11 = vld [vmem:[#allocation5 + $0x28] sm:$0xff]   ;;  %v862_v13 = vld [vmem:[#allocation5 + $0x30] sm:$0xff]   ;;  %v868_v14 = vld [vmem:[#allocation7 + $0x20] sm:$0xff]   ;;  %s1053_s22 = smov [#allocation8]  }
  0x6f   : > { %759 = vmatprep.mubr.bf16.mxu0 %v279_v6  ;;  %765 = vmatprep.subr.bf16.mxu1 %v865_v8  ;;  %v863_v15 = vld [vmem:[#allocation5 + $0x38] sm:$0xff]   ;;  %v869_v16 = vld [vmem:[#allocation7 + $0x28] sm:$0xff]   ;;  %v277_v17 = vld [vmem:[%s1264_s6 + $0x10] sm:$0xff]  ;;  %p976_p1 = pnand %p975_p11, %p1355_p0  ;;  %s978_s17 = sshll.u32 %s1053_s22, 4  ;;  %s979_s17 = int_to_ptr.vmem [resolvable:$false] %s978_s17 }
  0x70   : > { %746 = vmatpush3.bf16.msra.mxu0 %v857_v1  ;;  %v278_v18 = vld [vmem:[%s1264_s6 + $0x18] sm:$0xff]  ;;  %v870_v20 = vld [vmem:[#allocation7 + $0x30] sm:$0xff]   ;;  %v698_v22 = vld [vmem:[%s1338_s2] ss:$0 sm:$0xff]  ;;  %s980_s7 = scalar_lea.vmem %s979_s17, 1024  ;;  %p981_p7 = scmp.lt.s32.totalorder %s1287_s28, %s979_s17 }
  0x71   : > { %747 = vmatprep.subr.bf16.mxu0 %v858_v2  ;;  %v280_v19 = vpack.c.bf16 %v278_v18, %v277_v17  ;;  %v871_v21 = vld [vmem:[#allocation7 + $0x38] sm:$0xff]   ;;  %v707_v37 = vld [vmem:[%s1340_s4] ss:$0 sm:$0xff]  ;;  %p977_p3 = pneg %p976_p1  ;;  %p982_p9 = scmp.lt.s32.totalorder %s980_s7, %s974_s13 }
  0x72   : > { %766 = vmatpush3.bf16.msra.mxu1 %v865_v8 }
  0x73   : > { %767 = vmatprep.subr.bf16.mxu1 %v866_v10  ;;  %p983_p12 = por %p982_p9, %p981_p7 }
  0x74   : > { %748 = vmatpush3.bf16.msra.mxu0 %v858_v2 }
  0x75   : > { %749 = vmatprep.subr.bf16.mxu0 %v859_v3  ;;  %p984_p2 = pnand %p983_p12, %p977_p3 }
  0x76   : > { %768 = vmatpush3.bf16.msra.mxu1 %v866_v10 }
  0x77   : > { %769 = vmatprep.subr.bf16.mxu1 %v867_v12 }
  0x78   : > { %750 = vmatpush3.bf16.msra.mxu0 %v859_v3 }
  0x79   : > { %751 = vmatprep.subr.bf16.mxu0 %v860_v9 }
  0x7a   : > { %770 = vmatpush3.bf16.msra.mxu1 %v867_v12 }
  0x7b   : > { %771 = vmatprep.subr.bf16.mxu1 %v868_v14 }
  0x7c   : > { %752 = vmatpush3.bf16.msra.mxu0 %v860_v9 }
  0x7d   : > { %753 = vmatprep.subr.bf16.mxu0 %v861_v11 }
  0x7e   : > { %772 = vmatpush3.bf16.msra.mxu1 %v868_v14 }
  0x7f   : > { %773 = vmatprep.subr.bf16.mxu1 %v869_v16 }
  0x80   : > { %754 = vmatpush3.bf16.msra.mxu0 %v861_v11 }
  0x81   : > { %755 = vmatprep.subr.bf16.mxu0 %v862_v13 }
  0x82   : > { %774 = vmatpush3.bf16.msra.mxu1 %v869_v16 }
  0x83   : > { %775 = vmatprep.subr.bf16.mxu1 %v870_v20 }
  0x84   : > { %756 = vmatpush3.bf16.msra.mxu0 %v862_v13 }
  0x85   : > { %757 = vmatprep.subr.bf16.mxu0 %v863_v15 }
  0x86   : > { %776 = vmatpush3.bf16.msra.mxu1 %v870_v20 }
  0x87   : > { %777 = vmatprep.subr.bf16.mxu1 %v871_v21 }
  0x88   : > { %758 = vmatpush3.bf16.msra.mxu0 %v863_v15 }
  0x8a   : > { %778 = vmatpush3.bf16.msra.mxu1 %v871_v21 }
  0x8b   : > { %760 = vmatmul.mubr.bf16.vlgmr.msra.gmra.mrb[0].mxu0 %v280_v19 }
 0x15e   : > { %v761_v23 = vpop.f32.mrb[0].mxu0 }
 0x15f   : > { %v395_v24 = vadd.f32 %v761_v23, %v698_v22  ;;  %v386_v25 = vpop.f32.mrb[1].mxu0 }
 0x160   : > { %v387_v26 = vadd.f32 %v698_v22, %v386_v25  ;;  %v762_v27 = vpop.f32.mrb[2].mxu0 }
 0x161   : > { %v398_v28 = vadd.f32 %v762_v27, %v698_v22  ;;  %v389_v29 = vpop.f32.mrb[3].mxu0  ;;  %v403_v31 = vmax.f32 %v395_v24, 0.0 }
 0x162   : > { %v390_v30 = vadd.f32 %v698_v22, %v389_v29  ;;  %v401_v33 = vmax.f32 %v387_v26, 0.0 }
 0x163   : > { %v404_v32 = vmax.f32 %v398_v28, 0.0 }
 0x164   : > { %v402_v34 = vmax.f32 %v390_v30, 0.0 }
 0x165   : > { %v406_v35 = vpack.c.bf16 %v404_v32, %v403_v31 }
 0x166   : > { %v405_v36 = vpack.c.bf16 %v402_v34, %v401_v33 }
 0x168   : > { %779 = vmatprep.mubr.bf16.mxu1 %v405_v36 }
 0x169   : > { %780 = vmatmul.mubr.bf16.vlgmr.msra.gmra.mrb[0].mxu1 %v406_v35 }
 0x23c   : > { %v781_v38 = vpop.f32.mrb[0].mxu1 }
 0x23d   : > { %v521_v39 = vadd.f32 %v781_v38, %v707_v37  ;;  %v512_v40 = vpop.f32.mrb[1].mxu1 }
 0x23e   : > { %v513_v41 = vadd.f32 %v707_v37, %v512_v40  ;;  %v782_v42 = vpop.f32.mrb[2].mxu1 }
 0x23f   : > { %531 = vmax.xlane.f32.xlu1 %v521_v39  ;;  %v515_v43 = vpop.f32.mrb[3].mxu1  ;;  %v524_v44 = vadd.f32 %v782_v42, %v707_v37 }
 0x240   : > { %527 = vmax.xlane.f32.xlu0 %v513_v41  ;;  %v516_v45 = vadd.f32 %v707_v37, %v515_v43 }
 0x243   : > { %533 = vmax.xlane.f32.xlu1 %v524_v44 }
 0x244   : > { %529 = vmax.xlane.f32.xlu0 %v516_v45 }
 0x2cc   : > { %v532_v46 = vpop.xlane.xlu1 %531 }
 0x2cd   : > { %v537_v47 = vsub.f32 %v521_v39, %v532_v46  ;;  %v528_v48 = vpop.xlane.xlu0 %527 }
 0x2ce   : > { %v535_v49 = vsub.f32 %v513_v41, %v528_v48 }
 0x2cf   : > { %v543_v52 = vmul.f32 1.442695, %v537_v47 }
 0x2d0   : > { %v539_v50 = vmul.f32 1.442695, %v535_v49  ;;  %v534_v51 = vpop.xlane.xlu1 %533 }
 0x2d1   : > { %v530_v53 = vpop.xlane.xlu0 %529  ;;  %v538_v54 = vsub.f32 %v524_v44, %v534_v51 }
 0x2d2   : > { %872 = vpow2.f32 %v539_v50  ;;  %v536_v55 = vsub.f32 %v516_v45, %v530_v53 }
 0x2d3   : > { %874 = vpow2.f32 %v543_v52  ;;  %v545_v57 = vmul.f32 1.442695, %v538_v54 }
 0x2d4   : > { %v541_v56 = vmul.f32 1.442695, %v536_v55 }
 0x2d6   : > { %876 = vpow2.f32 %v541_v56 }
 0x2d7   : > { %878 = vpow2.f32 %v545_v57 }
 0x2dc   : > { %v873_v58 = vpop.eup %872 }
 0x2dd   : > { %547 = vadd.xlane.f32.xlu0 %v873_v58  ;;  %v875_v59 = vpop.eup %874 }
 0x2e0   : > { %v877_v60 = vpop.eup %876 }
 0x2e1   : > { %551 = vadd.xlane.f32.xlu0 %v875_v59  ;;  %549 = vadd.xlane.f32.xlu1 %v877_v60  ;;  %v879_v61 = vpop.eup %878 }
 0x2e5   : > { %553 = vadd.xlane.f32.xlu1 %v879_v61 }
 0x36a   : > { %v548_v62 = vpop.xlane.xlu0 %547 }
 0x36b   : > { %880 = vrcp.f32 %v548_v62 }
 0x36e   : > { %v550_v63 = vpop.xlane.xlu1 %549  ;;  %v552_v0 = vpop.xlane.xlu0 %551 }
 0x36f   : > { %882 = vrcp.f32 %v550_v63 }
 0x370   : > { %884 = vrcp.f32 %v552_v0 }
 0x372   : > { %v554_v1 = vpop.xlane.xlu1 %553 }
 0x373   : > { %886 = vrcp.f32 %v554_v1 }
 0x375   : > { %v881_v2 = vpop.eup %880 }
 0x376   : > { %v559_v3 = vmul.f32 %v881_v2, %v548_v62 }
 0x378   : > { %v563_v4 = vsub.f32 2.0, %v559_v3 }
 0x379   : > { %v883_v5 = vpop.eup %882 }
 0x37a   : > { %v885_v6 = vpop.eup %884  ;;  %v567_v7 = vmul.f32 %v881_v2, %v563_v4  ;;  %v560_v8 = vmul.f32 %v883_v5, %v550_v63 }
 0x37b   : > { %v561_v9 = vmul.f32 %v885_v6, %v552_v0 }
 0x37c   : > { %v571_v10 = vmul.f32 %v873_v58, %v567_v7  ;;  %v564_v11 = vsub.f32 2.0, %v560_v8 }
 0x37d   : > { %v887_v12 = vpop.eup %886  ;;  %v565_v13 = vsub.f32 2.0, %v561_v9 }
 0x37e   : > { %575 = vst [vmem:[%s271_s11] sm:$0xff] %v571_v10  ;;  %v568_v14 = vmul.f32 %v883_v5, %v564_v11  ;;  %v562_v15 = vmul.f32 %v887_v12, %v554_v1 }
 0x37f   : > { %v569_v16 = vmul.f32 %v885_v6, %v565_v13 }
 0x380   : > { %v572_v17 = vmul.f32 %v877_v60, %v568_v14  ;;  %v566_v18 = vsub.f32 2.0, %v562_v15 }
 0x381   : > { %v573_v19 = vmul.f32 %v875_v59, %v569_v16 }
 0x382   : > { %576 = vst [vmem:[%s271_s11 + $0x8] sm:$0xff] %v572_v17  ;;  %v570_v20 = vmul.f32 %v887_v12, %v566_v18 }
 0x383   : > { %577 = vst [vmem:[%s271_s11 + $0x10] sm:$0xff] %v573_v19 }
 0x384   : > { %v574_v21 = vmul.f32 %v879_v61, %v570_v20 }
 0x386   : > { %578 = vst [vmem:[%s271_s11 + $0x18] sm:$0xff] %v574_v21 }
 0x387   : > { %987 = shalt.err (!%p984_p2)
}
 0x388   : > { %s988_s6 = scalar_lea.hbm %s1292_s9, 512  ;;  %s992_s8 = scalar_lea.hbm %s1341_s5, 1024 }
 0x389   : > { %p989_p13 = scmp.ne.s32.totalorder %s1292_s9, %s988_s6  ;;  %p993_p4 = scmp.lt.u32.totalorder %s1292_s9, %s1341_s5 }
 0x38a   : > { %p994_p5 = scmp.lt.u32.totalorder %s992_s8, %s988_s6  ;;  %p996_p11 = scmp.lt.u32.totalorder %s988_s6, %s1292_s9 }
 0x38b   : > { %p990_p6 = pnand %p989_p13, %p1355_p0 }
 0x38c   : > { %p995_p8 = por %p994_p5, %p993_p4 }
 0x38d   : > { %p991_p10 = pneg %p990_p6 }
 0x38e   : > { %p997_p1 = por %p996_p11, %p995_p8 }
 0x390   : > { %p998_p3 = pnand %p997_p1, %p991_p10 }
 0x392   : > { %1001 = shalt.err (!%p998_p3)
}
 0x393   : > { %s1054_s30 = smov 128   ;;  %s1055_s15 = smov 8  }
 0x394   : > { %793 = dma.vmem_to_hbm [thread:$0]  (%p1355_p0), %s1287_s28, 512, %s1292_s9, %s580_s12, %s1054_s30, %s1054_s30, %s1055_s15  }
 0x395 PF: > { %s608_s16 = sand.u32 1, %s1032_s18   ;;  %p1356_p7 = scmp.ne.s32.totalorder %s1346_s25, 0 }
 0x396   : > { %p1357_p9 = scmp.ge.s32.totalorder %s1044_s21, 2  ;;  %s609_s13 = scalar_lea.sflag [#allocation4], %s608_s16 }
 0x398   : > { %p807_p12 = pnand %p1357_p9, %p1356_p7 }
 0x39a   : > { %1027 = dma.done.wait (!%p807_p12), %s609_s13, 512  }
 0x39b   : > { %1029 = vsyncadd (!%p807_p12), %s609_s13, 4294966784  ;;  %p19_p2 = scmp.ge.s32.totalorder %s1196_s14, 4   ;;  %s1358_s18 = smov %s1036_s19 }
 0x39c   : > { %s1359_s19 = smov %s1040_s20  ;;  %s1360_s20 = smov %s1212_s27 }
 0x39d   : > { %s1361_s21 = smov %s1196_s14  ;;  %21 = sbr.rel (!%p19_p2) target bundleno = 6 (0x6), region = 93 }
 0x3a4   :  { %614 = vsyncpa [#allocation3], 1 }
 0x3a5   :  { %616 = vsyncpa [#allocation3 + $0x1], 1 }
 0x3a6   :  { %617 = vsyncpa [#allocation6], 1 }
 0x3a7   :  { %618 = vsyncpa [#allocation4], 1 }
 0x3a8   :  { %620 = vsyncpa [#allocation4 + $0x1], 1 }

</bundles_post_ra>
